<compile_context>
chip_gen: v6e
topology: v6e:2x2x1
jax: 0.10.0
libtpu: 0.0.40
codegen_flags: <defaults>
</compile_context>

<pallas_src>
import functools

import jax
import jax.numpy as jnp
from jax.experimental import pallas as pl
from jax.experimental.pallas import tpu as pltpu


_LANE = 128
_SUBLANE = 8


# ----------------------------- small helpers --------------------------------

def _round_up(n, m):
    return ((n + m - 1) // m) * m


def _pad_axis(a, axis, target):
    pad = target - a.shape[axis]
    if pad <= 0:
        return a
    widths = [(0, 0)] * a.ndim
    widths[axis] = (0, pad)
    return jnp.pad(a, widths)


def _tpu_env():
    """Return (vmem_capacity_bytes, is_v7x); conservative if queries fail."""
    vmem = None
    is_v7x = False
    try:
        kind = jax.devices()[0].device_kind.lower()
        is_v7x = ("v7" in kind) or ("tpu7" in kind)
        vmem = (64 << 20) if is_v7x else (128 << 20)
    except Exception:
        pass
    try:
        info = pltpu.get_tpu_info()
        cap = int(getattr(info, "vmem_capacity_bytes", 0))
        if cap > 0:
            vmem = cap
            is_v7x = is_v7x or cap <= (64 << 20)
    except Exception:
        pass
    if vmem is None:
        vmem = 64 << 20                       # nothing queryable: be safe
    return vmem, is_v7x


def _buffered_blockspec_supported():
    """Does this JAX accept pipeline_mode=pl.Buffered(1) on a BlockSpec?"""
    try:
        pl.BlockSpec((_SUBLANE, _LANE), lambda i: (0, 0),
                     pipeline_mode=pl.Buffered(1))
        return True
    except Exception:
        return False


def _choose_block_m(B, max_feat, *, is_v7x, target_bytes=6 << 20,
                    floor=256, ceiling=1024):
    """Batch tile: near-even split of B into multiple-of-8 tiles.

    cap rows keep ~target_bytes of live f32 activation; block_m is floored at
    `floor` rows so the MXU M dimension stays well fed.  On v7x only, force a
    second grid step (megacore) when that keeps block_m >= 256.
    """
    cap = target_bytes // (max_feat * 4)
    cap = max(floor, min(ceiling, (cap // _SUBLANE) * _SUBLANE))
    cap = max(_SUBLANE, cap)
    num_steps = pl.cdiv(B, cap)
    if is_v7x and num_steps == 1 and pl.cdiv(B, 2) >= 256:
        num_steps = 2
    block_m = _round_up(pl.cdiv(B, num_steps), _SUBLANE)
    return min(block_m, _round_up(max(B, 1), _SUBLANE))


def _pick_feature_tile(dim, cap=512):
    """Largest multiple of 128, <= cap, that divides dim (dim % 128 == 0)."""
    t = (min(cap, dim) // _LANE) * _LANE
    while t > _LANE and dim % t != 0:
        t -= _LANE
    return max(t, _LANE)


# ----------------------------- kernel bodies ---------------------------------

def _mlp_fused_kernel(n_layers, x_ref, *refs):
    """Fused MLP on one batch tile.  refs = (w0, b0, ..., w_{L-1}, b_{L-1}, out)."""
    out_ref = refs[-1]
    params = refs[:-1]
    h = x_ref[...]                                   # single cast below per layer
    for i in range(n_layers):
        w = params[2 * i][...]
        b = params[2 * i + 1][...]
        # MXU matmul in the weights' storage dtype (bf16 weights take the fast
        # MXU path on v5e/v6e/v7x); always accumulate in f32.
        acc = jnp.dot(h.astype(w.dtype), w, preferred_element_type=jnp.float32)
        acc = acc + b.astype(jnp.float32)            # f32 bias add (VPU)
        if i < n_layers - 1:
            h = jnp.maximum(acc, 0.0)                # f32 ReLU; downcast to next
        else:                                        # layer's dtype fuses with it
            out_ref[...] = acc.astype(out_ref.dtype)


def _layer_kernel(apply_relu, x_ref, w_ref, b_ref, o_ref, acc_ref):
    """One Linear (+ optional ReLU) with K-reduction grid axis (axis 2)."""
    @pl.when(pl.program_id(2) == 0)
    def _():
        acc_ref[...] = jnp.zeros_like(acc_ref)

    acc_ref[...] += jnp.dot(x_ref[...].astype(w_ref.dtype), w_ref[...],
                            preferred_element_type=jnp.float32)

    @pl.when(pl.program_id(2) == pl.num_programs(2) - 1)
    def _():
        r = acc_ref[...] + b_ref[...].astype(jnp.float32)
        if apply_relu:
            r = jnp.maximum(r, 0.0)
        o_ref[...] = r.astype(o_ref.dtype)


# ----------------------------- streaming fallback ----------------------------

def _streaming_forward(x_pad, params_pad, block_m, out_dtype, vmem_budget):
    """Per-layer pipelined path for configs whose weights do not fit resident
    in VMEM (most relevant on v7x's 64 MiB).  Weights are streamed from HBM in
    (tk, tn) blocks, double-buffered by the BlockSpec pipeline.
    # TODO(synk): a fully fused variant via pltpu.emit_pipeline over layers
    # would also avoid the intermediate activation HBM round-trips.
    """
    n_layers = len(params_pad) // 2
    h = x_pad
    M = h.shape[0]
    tm = min(block_m, M)
    for li in range(n_layers):
        w, b = params_pad[2 * li], params_pad[2 * li + 1]
        fi, fo = w.shape
        last = li == n_layers - 1
        tk = _pick_feature_tile(fi)
        tn = _pick_feature_tile(fo)
        grid = (M // tm, fo // tn, fi // tk)

        h_elt = jnp.dtype(h.dtype).itemsize
        w_elt = jnp.dtype(w.dtype).itemsize
        o_dtype = out_dtype if last else w.dtype
        o_elt = jnp.dtype(o_dtype).itemsize

        need = (2 * (tm * tk * h_elt + tk * tn * w_elt + tn * w_elt)   # dbl-buf in
                + 2 * tm * tn * o_elt                                  # dbl-buf out
                + tm * tn * 4                                          # f32 acc
                + (4 << 20))                                           # headroom
        vmem_limit = int(min(vmem_budget, max(32 << 20, need)))

        cost = pl.CostEstimate(
            flops=2 * M * fi * fo,
            transcendentals=0,
            # x re-fetched per N tile, W re-fetched per M tile, output once.
            bytes_accessed=int(h.size) * h_elt * (fo // tn)
                           + int(w.size) * w_elt * (M // tm)
                           + M * fo * o_elt)

        h = pl.pallas_call(
            functools.partial(_layer_kernel, not last),
            grid=grid,
            in_specs=[pl.BlockSpec((tm, tk), lambda i, j, k: (i, k)),
                      pl.BlockSpec((tk, tn), lambda i, j, k: (k, j)),
                      pl.BlockSpec((1, tn), lambda i, j, k: (0, j))],
            out_specs=pl.BlockSpec((tm, tn), lambda i, j, k: (i, j)),
            out_shape=jax.ShapeDtypeStruct((M, fo), o_dtype),
            scratch_shapes=[pltpu.VMEM((tm, tn), jnp.float32)],
            compiler_params=pltpu.CompilerParams(
                dimension_semantics=("parallel", "parallel", "arbitrary"),
                vmem_limit_bytes=vmem_limit),
            cost_estimate=cost,
        )(h, w, b)
    return h


# ----------------------------- forward pass ----------------------------------

def rectangular_mlp_forward(x, params, *, block_m=None, force_streaming=False):
    """x: [B, input_size]; params: flat list [w0, b0, w1, b1, ...]."""
    B, _ = x.shape
    n_layers = len(params) // 2
    out_size = params[-2].shape[1]

    # ---- pad feature dims to multiples of 128 (lane-dense MXU + stores) ----
    params_pad, feat_dims = [], []
    for i in range(n_layers):
        w, b = params[2 * i], params[2 * i + 1]
        fi_p = _round_up(w.shape[0], _LANE)
        fo_p = _round_up(w.shape[1], _LANE)
        feat_dims.append((fi_p, fo_p))
        params_pad.append(_pad_axis(_pad_axis(w, 0, fi_p), 1, fo_p))
        params_pad.append(_pad_axis(b, 1, fo_p))
    in_pad = feat_dims[0][0]
    out_pad = feat_dims[-1][1]
    max_feat = max(max(d) for d in feat_dims)

    # ---- hardware-aware VMEM budget ----
    vmem_cap, is_v7x = _tpu_env()
    vmem_budget = int(vmem_cap * 0.85)   # ~108 MiB on 128 MiB, ~54 MiB on 64 MiB

    # ---- batch tile ----
    if block_m is None:
        block_m = _choose_block_m(B, max_feat, is_v7x=is_v7x)
    block_m = max(_SUBLANE,
                  (min(block_m, _round_up(B, _SUBLANE)) // _SUBLANE) * _SUBLANE)
    B_pad = _round_up(B, block_m)
    x_pad = _pad_axis(_pad_axis(x, 0, B_pad), 1, in_pad)
    grid_m = B_pad // block_m

    # ---- VMEM accounting (matches the BlockSpecs actually emitted) ----
    x_elt = jnp.dtype(x.dtype).itemsize
    w_bytes = sum(int(p.size) * jnp.dtype(p.dtype).itemsize for p in params_pad)
    io_bytes = 2 * block_m * (in_pad + out_pad) * x_elt   # double-buffered x/out
    act_bytes = 2 * block_m * max_feat * 4                # live f32 activations
    headroom = 6 << 20
    need_single = io_bytes + w_bytes + act_bytes + headroom       # Buffered(1)
    need_double = io_bytes + 2 * w_bytes + act_bytes + headroom   # default 2-buf

    single_ok = _buffered_blockspec_supported()
    fits_single = single_ok and need_single <= vmem_budget
    fits_double = need_double <= vmem_budget

    def run_fused(single_buffer_weights, need):
        vmem_limit = int(min(vmem_budget, max(32 << 20, need)))
        cost = pl.CostEstimate(
            flops=2 * B_pad * sum(fi * fo for fi, fo in feat_dims),
            transcendentals=0,
            # Weight blocks have a constant index_map, so they are DMA'd once
            # regardless of grid steps; x/out counted at padded sizes.
            bytes_accessed=int(x_pad.size) * x_elt + w_bytes
                           + B_pad * out_pad * x_elt)
        in_specs = [pl.BlockSpec((block_m, in_pad), lambda i: (i, 0))]
        for p in params_pad:
            if single_buffer_weights:
                # Constant index_map => double-buffering would be pure waste.
                spec = pl.BlockSpec(p.shape, lambda i: (0, 0),
                                    pipeline_mode=pl.Buffered(1))
            else:
                spec = pl.BlockSpec(p.shape, lambda i: (0, 0))
            in_specs.append(spec)
        call = pl.pallas_call(
            functools.partial(_mlp_fused_kernel, n_layers),
            grid=(grid_m,),
            in_specs=in_specs,
            out_specs=pl.BlockSpec((block_m, out_pad), lambda i: (i, 0)),
            out_shape=jax.ShapeDtypeStruct((B_pad, out_pad), x.dtype),
            compiler_params=pltpu.CompilerParams(
                dimension_semantics=("parallel",),
                vmem_limit_bytes=vmem_limit),
            cost_estimate=cost,
        )
        return call(x_pad, *params_pad)

    out = None
    if not force_streaming and (fits_single or fits_double):
        if fits_single:
            try:
                out = run_fused(True, need_single)
            except Exception:
                # pipeline_mode=Buffered(1) rejected at lowering on this jax
                # version: fall through only to paths whose VMEM budget was
                # re-checked (double-buffered fused, else streaming).
                out = None
        if out is None and fits_double:
            out = run_fused(False, need_double)

    if out is None:
        # Weights (or the fused working set) don't fit VMEM: stream per layer.
        out = _streaming_forward(x_pad, params_pad, block_m, x.dtype,
                                 vmem_budget)

    return out[:B, :out_size]


# ----------------------------- init & reference ------------------------------

def init_rectangular_mlp_params(key, depth, width, input_size, output_size,
                                dtype=jnp.float32):
    """Mirrors torch.nn.Linear default init (uniform +-1/sqrt(fan_in)).
    Weights stored as [in_features, out_features]; bias as [1, out_features].
    Pass dtype=jnp.bfloat16 for the fast MXU / half-VMEM weight path."""
    dims = []
    in_f = input_size
    for _ in range(depth - 1):
        dims.append((in_f, width))
        in_f = width
    dims.append((in_f, output_size))

    params = []
    for (fan_in, fan_out) in dims:
        key, kw, kb = jax.random.split(key, 3)
        bound = 1.0 / (fan_in ** 0.5)
        w = jax.random.uniform(kw, (fan_in, fan_out), jnp.float32,
                               minval=-bound, maxval=bound).astype(dtype)
        b = jax.random.uniform(kb, (1, fan_out), jnp.float32,
                               minval=-bound, maxval=bound).astype(dtype)
        params.extend([w, b])
    return params


def _reference_forward(x, params):
    n_layers = len(params) // 2
    h = x.astype(jnp.float32)
    for i in range(n_layers):
        h = jnp.dot(h, params[2 * i].astype(jnp.float32),
                    preferred_element_type=jnp.float32)
        h = h + params[2 * i + 1].astype(jnp.float32)
        if i < n_layers - 1:
            h = jnp.maximum(h, 0.0)
    return h.astype(x.dtype)


# ----------------------------- test -----------------------------------------

if __name__ == "__main__":
    # RectangularMLP(depth=3, width=32, input_size=16, output_size=8)
    depth, width, input_size, output_size = 3, 32, 16, 8
    batch = 64

    key = jax.random.PRNGKey(0)
    key, kx = jax.random.split(key)
    x = jax.random.normal(kx, (batch, input_size), jnp.float32)
    params = init_rectangular_mlp_params(key, depth, width, input_size,
                                         output_size)
    ref = _reference_forward(x, params)

    # Fused, VMEM-resident-weights path (f32, tight tolerance).
    out = jax.block_until_ready(rectangular_mlp_forward(x, params))
    assert out.shape == (batch, output_size)
    assert jnp.allclose(out, ref, atol=1e-4, rtol=1e-4), \
        float(jnp.max(jnp.abs(out - ref)))

    # Streaming (weights-don't-fit-VMEM) fallback path, forced.
    out_s = jax.block_until_ready(
        rectangular_mlp_forward(x, params, force_streaming=True))
    assert out_s.shape == (batch, output_size)
    assert jnp.allclose(out_s, ref, atol=1e-4, rtol=1e-4), \
        float(jnp.max(jnp.abs(out_s - ref)))

    # bf16-weight smoke test (fast MXU path; loose check, f32 accumulation).
    params_bf16 = [p.astype(jnp.bfloat16) for p in params]
    out_bf = jax.block_until_ready(rectangular_mlp_forward(x, params_bf16))
    assert out_bf.shape == (batch, output_size)
    assert bool(jnp.all(jnp.isfinite(out_bf.astype(jnp.float32))))
    assert jnp.allclose(out_bf, ref, atol=0.1, rtol=0.1)

    print("KERNEL_OK")
</pallas_src>

<mosaic_0001>
module attributes {stable_mosaic.version = 11 : i64} {
  func.func @_mlp_fused_kernel(%arg0: i32, %arg1: memref<64x128xf32, #tpu.memory_space<vmem>>, %arg2: memref<128x128xf32, #tpu.memory_space<vmem>>, %arg3: memref<1x128xf32, #tpu.memory_space<vmem>>, %arg4: memref<128x128xf32, #tpu.memory_space<vmem>>, %arg5: memref<1x128xf32, #tpu.memory_space<vmem>>, %arg6: memref<128x128xf32, #tpu.memory_space<vmem>>, %arg7: memref<1x128xf32, #tpu.memory_space<vmem>>, %arg8: memref<64x128xf32, #tpu.memory_space<vmem>>) attributes {dimension_semantics = [#tpu.dimension_semantics<parallel>], iteration_bounds = array<i64: 1>, scalar_prefetch = 0 : i64, scratch_operands = 0 : i64, tpu.core_type = #tpu.core_type<tc>, window_params = [{transform_indices = @transform_0, window_bounds = array<i64: 64, 128>}, {pipeline_mode = #tpu.pipeline_mode<synchronous>, transform_indices = @transform_1, window_bounds = array<i64: 128, 128>}, {pipeline_mode = #tpu.pipeline_mode<synchronous>, transform_indices = @transform_2, window_bounds = array<i64: 1, 128>}, {pipeline_mode = #tpu.pipeline_mode<synchronous>, transform_indices = @transform_3, window_bounds = array<i64: 128, 128>}, {pipeline_mode = #tpu.pipeline_mode<synchronous>, transform_indices = @transform_4, window_bounds = array<i64: 1, 128>}, {pipeline_mode = #tpu.pipeline_mode<synchronous>, transform_indices = @transform_5, window_bounds = array<i64: 128, 128>}, {pipeline_mode = #tpu.pipeline_mode<synchronous>, transform_indices = @transform_6, window_bounds = array<i64: 1, 128>}, {transform_indices = @transform_7, window_bounds = array<i64: 64, 128>}]} {
    %c0 = arith.constant 0 : index
    %c0_0 = arith.constant 0 : index
    %0 = vector.load %arg1[%c0, %c0_0] : memref<64x128xf32, #tpu.memory_space<vmem>>, vector<64x128xf32>
    %c0_1 = arith.constant 0 : index
    %c0_2 = arith.constant 0 : index
    %1 = vector.load %arg2[%c0_1, %c0_2] : memref<128x128xf32, #tpu.memory_space<vmem>>, vector<128x128xf32>
    %c0_3 = arith.constant 0 : index
    %c0_4 = arith.constant 0 : index
    %2 = vector.load %arg3[%c0_3, %c0_4] : memref<1x128xf32, #tpu.memory_space<vmem>>, vector<1x128xf32>
    %cst = arith.constant dense<0.000000e+00> : vector<64x128xf32>
    %3 = tpu.matmul %0, %1, %cst {dimension_numbers = #tpu.dot_dimension_numbers<[1], [0], [0], [1], [0, 0, 1, 1], [], []>} : vector<64x128xf32>, vector<128x128xf32>, vector<64x128xf32> -> vector<64x128xf32>
    %4 = vector.broadcast %2 : vector<1x128xf32> to vector<64x128xf32>
    %5 = arith.addf %3, %4 : vector<64x128xf32>
    %cst_5 = arith.constant 0.000000e+00 : f32
    %6 = vector.broadcast %cst_5 : f32 to vector<64x128xf32>
    %7 = arith.maximumf %5, %6 : vector<64x128xf32>
    %c0_6 = arith.constant 0 : index
    %c0_7 = arith.constant 0 : index
    %8 = vector.load %arg4[%c0_6, %c0_7] : memref<128x128xf32, #tpu.memory_space<vmem>>, vector<128x128xf32>
    %c0_8 = arith.constant 0 : index
    %c0_9 = arith.constant 0 : index
    %9 = vector.load %arg5[%c0_8, %c0_9] : memref<1x128xf32, #tpu.memory_space<vmem>>, vector<1x128xf32>
    %cst_10 = arith.constant dense<0.000000e+00> : vector<64x128xf32>
    %10 = tpu.matmul %7, %8, %cst_10 {dimension_numbers = #tpu.dot_dimension_numbers<[1], [0], [0], [1], [0, 0, 1, 1], [], []>} : vector<64x128xf32>, vector<128x128xf32>, vector<64x128xf32> -> vector<64x128xf32>
    %11 = vector.broadcast %9 : vector<1x128xf32> to vector<64x128xf32>
    %12 = arith.addf %10, %11 : vector<64x128xf32>
    %cst_11 = arith.constant 0.000000e+00 : f32
    %13 = vector.broadcast %cst_11 : f32 to vector<64x128xf32>
    %14 = arith.maximumf %12, %13 : vector<64x128xf32>
    %c0_12 = arith.constant 0 : index
    %c0_13 = arith.constant 0 : index
    %15 = vector.load %arg6[%c0_12, %c0_13] : memref<128x128xf32, #tpu.memory_space<vmem>>, vector<128x128xf32>
    %c0_14 = arith.constant 0 : index
    %c0_15 = arith.constant 0 : index
    %16 = vector.load %arg7[%c0_14, %c0_15] : memref<1x128xf32, #tpu.memory_space<vmem>>, vector<1x128xf32>
    %cst_16 = arith.constant dense<0.000000e+00> : vector<64x128xf32>
    %17 = tpu.matmul %14, %15, %cst_16 {dimension_numbers = #tpu.dot_dimension_numbers<[1], [0], [0], [1], [0, 0, 1, 1], [], []>} : vector<64x128xf32>, vector<128x128xf32>, vector<64x128xf32> -> vector<64x128xf32>
    %18 = vector.broadcast %16 : vector<1x128xf32> to vector<64x128xf32>
    %19 = arith.addf %17, %18 : vector<64x128xf32>
    %c0_17 = arith.constant 0 : index
    %c0_18 = arith.constant 0 : index
    %20 = vector.load %arg8[%c0_17, %c0_18] : memref<64x128xf32, #tpu.memory_space<vmem>>, vector<64x128xf32>
    tpu.vector_store %arg8[%c0_17, %c0_18], %19 {strides = array<i32>} : memref<64x128xf32, #tpu.memory_space<vmem>>, vector<64x128xf32>,
    return
  }
  func.func @transform_0(%arg0: i32) -> (i32, i32) {
    %c0_i32 = arith.constant 0 : i32
    %c0_i32_0 = arith.constant 0 : i32
    return %arg0, %c0_i32 : i32, i32
  }
  func.func @transform_1(%arg0: i32) -> (i32, i32) {
    %c0_i32 = arith.constant 0 : i32
    %c0_i32_0 = arith.constant 0 : i32
    %c0_i32_1 = arith.constant 0 : i32
    return %c0_i32, %c0_i32_0 : i32, i32
  }
  func.func @transform_2(%arg0: i32) -> (i32, i32) {
    %c0_i32 = arith.constant 0 : i32
    %c0_i32_0 = arith.constant 0 : i32
    %c0_i32_1 = arith.constant 0 : i32
    return %c0_i32, %c0_i32_0 : i32, i32
  }
  func.func @transform_3(%arg0: i32) -> (i32, i32) {
    %c0_i32 = arith.constant 0 : i32
    %c0_i32_0 = arith.constant 0 : i32
    %c0_i32_1 = arith.constant 0 : i32
    return %c0_i32, %c0_i32_0 : i32, i32
  }
  func.func @transform_4(%arg0: i32) -> (i32, i32) {
    %c0_i32 = arith.constant 0 : i32
    %c0_i32_0 = arith.constant 0 : i32
    %c0_i32_1 = arith.constant 0 : i32
    return %c0_i32, %c0_i32_0 : i32, i32
  }
  func.func @transform_5(%arg0: i32) -> (i32, i32) {
    %c0_i32 = arith.constant 0 : i32
    %c0_i32_0 = arith.constant 0 : i32
    %c0_i32_1 = arith.constant 0 : i32
    return %c0_i32, %c0_i32_0 : i32, i32
  }
  func.func @transform_6(%arg0: i32) -> (i32, i32) {
    %c0_i32 = arith.constant 0 : i32
    %c0_i32_0 = arith.constant 0 : i32
    %c0_i32_1 = arith.constant 0 : i32
    return %c0_i32, %c0_i32_0 : i32, i32
  }
  func.func @transform_7(%arg0: i32) -> (i32, i32) {
    %c0_i32 = arith.constant 0 : i32
    %c0_i32_0 = arith.constant 0 : i32
    return %arg0, %c0_i32 : i32, i32
  }
}

module attributes {stable_mosaic.version = 11 : i64} {
  func.func @_mlp_fused_kernel(%arg0: i32, %arg1: memref<64x128xf32, #tpu.memory_space<vmem>>, %arg2: memref<128x128xf32, #tpu.memory_space<vmem>>, %arg3: memref<1x128xf32, #tpu.memory_space<vmem>>, %arg4: memref<128x128xf32, #tpu.memory_space<vmem>>, %arg5: memref<1x128xf32, #tpu.memory_space<vmem>>, %arg6: memref<128x128xf32, #tpu.memory_space<vmem>>, %arg7: memref<1x128xf32, #tpu.memory_space<vmem>>, %arg8: memref<64x128xf32, #tpu.memory_space<vmem>>) attributes {dimension_semantics = [#tpu.dimension_semantics<parallel>], iteration_bounds = array<i64: 1>, scalar_prefetch = 0 : i64, scratch_operands = 0 : i64, tpu.core_type = #tpu.core_type<tc>, window_params = [{transform_indices = @transform_0, window_bounds = array<i64: 64, 128>}, {pipeline_mode = #tpu.pipeline_mode<synchronous>, transform_indices = @transform_1, window_bounds = array<i64: 128, 128>}, {pipeline_mode = #tpu.pipeline_mode<synchronous>, transform_indices = @transform_2, window_bounds = array<i64: 1, 128>}, {pipeline_mode = #tpu.pipeline_mode<synchronous>, transform_indices = @transform_3, window_bounds = array<i64: 128, 128>}, {pipeline_mode = #tpu.pipeline_mode<synchronous>, transform_indices = @transform_4, window_bounds = array<i64: 1, 128>}, {pipeline_mode = #tpu.pipeline_mode<synchronous>, transform_indices = @transform_5, window_bounds = array<i64: 128, 128>}, {pipeline_mode = #tpu.pipeline_mode<synchronous>, transform_indices = @transform_6, window_bounds = array<i64: 1, 128>}, {transform_indices = @transform_7, window_bounds = array<i64: 64, 128>}]} {
    %c0 = arith.constant 0 : index
    %c0_0 = arith.constant 0 : index
    %0 = vector.load %arg1[%c0, %c0_0] : memref<64x128xf32, #tpu.memory_space<vmem>>, vector<64x128xf32>
    %c0_1 = arith.constant 0 : index
    %c0_2 = arith.constant 0 : index
    %1 = vector.load %arg2[%c0_1, %c0_2] : memref<128x128xf32, #tpu.memory_space<vmem>>, vector<128x128xf32>
    %c0_3 = arith.constant 0 : index
    %c0_4 = arith.constant 0 : index
    %2 = vector.load %arg3[%c0_3, %c0_4] : memref<1x128xf32, #tpu.memory_space<vmem>>, vector<1x128xf32>
    %cst = arith.constant dense<0.000000e+00> : vector<64x128xf32>
    %3 = tpu.matmul %0, %1, %cst {dimension_numbers = #tpu.dot_dimension_numbers<[1], [0], [0], [1], [0, 0, 1, 1], [], []>} : vector<64x128xf32>, vector<128x128xf32>, vector<64x128xf32> -> vector<64x128xf32>
    %4 = vector.broadcast %2 : vector<1x128xf32> to vector<64x128xf32>
    %5 = arith.addf %3, %4 : vector<64x128xf32>
    %cst_5 = arith.constant 0.000000e+00 : f32
    %6 = vector.broadcast %cst_5 : f32 to vector<64x128xf32>
    %7 = arith.maximumf %5, %6 : vector<64x128xf32>
    %c0_6 = arith.constant 0 : index
    %c0_7 = arith.constant 0 : index
    %8 = vector.load %arg4[%c0_6, %c0_7] : memref<128x128xf32, #tpu.memory_space<vmem>>, vector<128x128xf32>
    %c0_8 = arith.constant 0 : index
    %c0_9 = arith.constant 0 : index
    %9 = vector.load %arg5[%c0_8, %c0_9] : memref<1x128xf32, #tpu.memory_space<vmem>>, vector<1x128xf32>
    %cst_10 = arith.constant dense<0.000000e+00> : vector<64x128xf32>
    %10 = tpu.matmul %7, %8, %cst_10 {dimension_numbers = #tpu.dot_dimension_numbers<[1], [0], [0], [1], [0, 0, 1, 1], [], []>} : vector<64x128xf32>, vector<128x128xf32>, vector<64x128xf32> -> vector<64x128xf32>
    %11 = vector.broadcast %9 : vector<1x128xf32> to vector<64x128xf32>
    %12 = arith.addf %10, %11 : vector<64x128xf32>
    %cst_11 = arith.constant 0.000000e+00 : f32
    %13 = vector.broadcast %cst_11 : f32 to vector<64x128xf32>
    %14 = arith.maximumf %12, %13 : vector<64x128xf32>
    %c0_12 = arith.constant 0 : index
    %c0_13 = arith.constant 0 : index
    %15 = vector.load %arg6[%c0_12, %c0_13] : memref<128x128xf32, #tpu.memory_space<vmem>>, vector<128x128xf32>
    %c0_14 = arith.constant 0 : index
    %c0_15 = arith.constant 0 : index
    %16 = vector.load %arg7[%c0_14, %c0_15] : memref<1x128xf32, #tpu.memory_space<vmem>>, vector<1x128xf32>
    %cst_16 = arith.constant dense<0.000000e+00> : vector<64x128xf32>
    %17 = tpu.matmul %14, %15, %cst_16 {dimension_numbers = #tpu.dot_dimension_numbers<[1], [0], [0], [1], [0, 0, 1, 1], [], []>} : vector<64x128xf32>, vector<128x128xf32>, vector<64x128xf32> -> vector<64x128xf32>
    %18 = vector.broadcast %16 : vector<1x128xf32> to vector<64x128xf32>
    %19 = arith.addf %17, %18 : vector<64x128xf32>
    %c0_17 = arith.constant 0 : index
    %c0_18 = arith.constant 0 : index
    %20 = vector.load %arg8[%c0_17, %c0_18] : memref<64x128xf32, #tpu.memory_space<vmem>>, vector<64x128xf32>
    tpu.vector_store %arg8[%c0_17, %c0_18], %19 {strides = array<i32>} : memref<64x128xf32, #tpu.memory_space<vmem>>, vector<64x128xf32>,
    return
  }
  func.func @transform_0(%arg0: i32) -> (i32, i32) {
    %c0_i32 = arith.constant 0 : i32
    %c0_i32_0 = arith.constant 0 : i32
    return %arg0, %c0_i32 : i32, i32
  }
  func.func @transform_1(%arg0: i32) -> (i32, i32) {
    %c0_i32 = arith.constant 0 : i32
    %c0_i32_0 = arith.constant 0 : i32
    %c0_i32_1 = arith.constant 0 : i32
    return %c0_i32, %c0_i32_0 : i32, i32
  }
  func.func @transform_2(%arg0: i32) -> (i32, i32) {
    %c0_i32 = arith.constant 0 : i32
    %c0_i32_0 = arith.constant 0 : i32
    %c0_i32_1 = arith.constant 0 : i32
    return %c0_i32, %c0_i32_0 : i32, i32
  }
  func.func @transform_3(%arg0: i32) -> (i32, i32) {
    %c0_i32 = arith.constant 0 : i32
    %c0_i32_0 = arith.constant 0 : i32
    %c0_i32_1 = arith.constant 0 : i32
    return %c0_i32, %c0_i32_0 : i32, i32
  }
  func.func @transform_4(%arg0: i32) -> (i32, i32) {
    %c0_i32 = arith.constant 0 : i32
    %c0_i32_0 = arith.constant 0 : i32
    %c0_i32_1 = arith.constant 0 : i32
    return %c0_i32, %c0_i32_0 : i32, i32
  }
  func.func @transform_5(%arg0: i32) -> (i32, i32) {
    %c0_i32 = arith.constant 0 : i32
    %c0_i32_0 = arith.constant 0 : i32
    %c0_i32_1 = arith.constant 0 : i32
    return %c0_i32, %c0_i32_0 : i32, i32
  }
  func.func @transform_6(%arg0: i32) -> (i32, i32) {
    %c0_i32 = arith.constant 0 : i32
    %c0_i32_0 = arith.constant 0 : i32
    %c0_i32_1 = arith.constant 0 : i32
    return %c0_i32, %c0_i32_0 : i32, i32
  }
  func.func @transform_7(%arg0: i32) -> (i32, i32) {
    %c0_i32 = arith.constant 0 : i32
    %c0_i32_0 = arith.constant 0 : i32
    return %arg0, %c0_i32 : i32, i32
  }
}

</mosaic_0001>

<bundles_post_ra>
// kernel: tpu_custom_call.1
= control target key start
LH: loop header
LB: loop body
LE: loop exit
PB: predicated region body
PF: predicated region fallthrough
CT: control target
= control target key end

     0   :  { %12 = vsyncpa [#allocation3], 0  ;;  %s981_s0 = inlined_call_operand.hbm [shape: f32[64,128], index: 0, kind: input, shape index: {}]   ;;  %s982_s1 = inlined_call_operand.hbm [shape: f32[128,128], index: 1, kind: input, shape index: {}]   ;;  %s983_s2 = inlined_call_operand.vmem [shape: f32[1,128], index: 2, kind: input, shape index: {}]   ;;  %s984_s3 = inlined_call_operand.hbm [shape: f32[128,128], index: 3, kind: input, shape index: {}]   ;;  %s985_s4 = inlined_call_operand.vmem [shape: f32[1,128], index: 4, kind: input, shape index: {}]   ;;  %s986_s5 = inlined_call_operand.hbm [shape: f32[128,128], index: 5, kind: input, shape index: {}]   ;;  %s987_s6 = inlined_call_operand.vmem [shape: f32[1,128], index: 6, kind: input, shape index: {}]   ;;  %s988_s7 = inlined_call_operand.hbm [shape: f32[64,128], index: 7, kind: output, shape index: {}]  }
   0x1   :  { %13 = vsyncpa [#allocation6], 0 }
   0x2   :  { %14 = vsyncpa [#allocation9], 0 }
   0x3   :  { %15 = vsyncpa [#allocation4], 0  ;;  %s871_s24 = smov [#allocation5]   ;;  %s872_s26 = smov [#allocation2]  }
   0x4   :  { %s33_s25 = sshll.u32 %s871_s24, 4  ;;  %s21_s27 = sshll.u32 %s872_s26, 4  ;;  %s34_s25 = int_to_ptr.vmem [resolvable:$true] %s33_s25  ;;  %s22_s27 = int_to_ptr.vmem [resolvable:$true] %s21_s27 }
   0x5   :  { %s771_s28 = scalar_lea.vmem %s34_s25, 2048  ;;  %p776_p1 = scmp.lt.s32.totalorder %s34_s25, %s34_s25 }
   0x6   :  { %p772_p0 = scmp.ne.s32.totalorder %s34_s25, %s771_s28  ;;  %p777_p2 = scmp.lt.s32.totalorder %s771_s28, %s771_s28 }
   0x8   :  { %p778_p3 = por %p777_p2, %p776_p1 }
   0xa   :  { %p779_p4 = pnand %p778_p3, %p772_p0 }
   0xc   :  { %782 = shalt.err (!%p779_p4)
}
   0xd   :  { %s873_s29 = smov 128   ;;  %s874_s30 = smov 8  }
   0xe   :  { %39 = dma.hbm_to_vmem [thread:$0]  %s982_s1, 2048, %s34_s25, [#allocation6], %s873_s29, %s873_s29, %s874_s30  }
   0xf   :  { %s791_s10 = scalar_lea.vmem %s22_s27, 1024  ;;  %p796_p6 = scmp.lt.s32.totalorder %s22_s27, %s22_s27 }
  0x10   :  { %p792_p5 = scmp.ne.s32.totalorder %s22_s27, %s791_s10  ;;  %p797_p7 = scmp.lt.s32.totalorder %s791_s10, %s791_s10 }
  0x12   :  { %p798_p8 = por %p797_p7, %p796_p6 }
  0x14   :  { %p799_p9 = pnand %p798_p8, %p792_p5 }
  0x16   :  { %802 = shalt.err (!%p799_p9)
}
  0x17   :  { %27 = dma.hbm_to_vmem [thread:$0]  %s981_s0, 1024, %s22_s27, [#allocation3], %s873_s29, %s873_s29, %s874_s30  }
  0x18   :  { %s875_s13 = smov [#allocation7]   ;;  %s876_s15 = smov [#allocation8]  }
  0x19   :  { %s47_s14 = sshll.u32 %s875_s13, 4  ;;  %s61_s16 = sshll.u32 %s876_s15, 4  ;;  %s48_s14 = int_to_ptr.vmem [resolvable:$true] %s47_s14  ;;  %s62_s16 = int_to_ptr.vmem [resolvable:$true] %s61_s16 }
  0x1a   :  { %s811_s1 = scalar_lea.vmem %s48_s14, 2048  ;;  %p816_p11 = scmp.lt.s32.totalorder %s48_s14, %s48_s14 }
  0x1b   :  { %p812_p10 = scmp.ne.s32.totalorder %s48_s14, %s811_s1  ;;  %p817_p12 = scmp.lt.s32.totalorder %s811_s1, %s811_s1 }
  0x1d   :  { %p818_p13 = por %p817_p12, %p816_p11 }
  0x1f   :  { %p819_p0 = pnand %p818_p13, %p812_p10 }
  0x21   :  { %822 = shalt.err (!%p819_p0)
}
  0x22   :  { %53 = dma.hbm_to_vmem [thread:$0]  %s984_s3, 2048, %s48_s14, [#allocation6], %s873_s29, %s873_s29, %s874_s30  }
  0x23   :  { %s831_s0 = scalar_lea.vmem %s62_s16, 2048  ;;  %p836_p2 = scmp.lt.s32.totalorder %s62_s16, %s62_s16 }
  0x24   :  { %p832_p1 = scmp.ne.s32.totalorder %s62_s16, %s831_s0  ;;  %p837_p3 = scmp.lt.s32.totalorder %s831_s0, %s831_s0 }
  0x26   :  { %p838_p4 = por %p837_p3, %p836_p2 }
  0x28   :  { %p839_p5 = pnand %p838_p4, %p832_p1 }
  0x2a   :  { %842 = shalt.err (!%p839_p5)
}
  0x2b   :  { %67 = dma.hbm_to_vmem [thread:$0]  %s986_s5, 2048, %s62_s16, [#allocation9], %s873_s29, %s873_s29, %s874_s30  }
  0x2c   :  { %863 = dma.done.wait [#allocation3], 1024  }
  0x2d   :  { %864 = vsyncadd [#allocation3], 4294966272 }
  0x2e   :  { %865 = dma.done.wait [#allocation6], 4096  }
  0x2f   :  { %866 = vsyncadd [#allocation6], 4294963200 }
  0x30   :  { %867 = dma.done.wait [#allocation9], 2048  }
  0x31   :  { %868 = vsyncadd [#allocation9], 4294965248  ;;  %v105_v0 = vld [vmem:[#allocation5 + $0x78] sm:$0xff]  ;;  %v104_v1 = vld [vmem:[#allocation5 + $0x70] sm:$0xff]  ;;  %s877_s23 = smov [#allocation10]  }
  0x32   :  { %592 = vmatprep.subr.mxu0 %v105_v0  ;;  %v103_v2 = vld [vmem:[#allocation5 + $0x68] sm:$0xff]  ;;  %v102_v3 = vld [vmem:[#allocation5 + $0x60] sm:$0xff]  ;;  %v101_v5 = vld [vmem:[#allocation5 + $0x58] sm:$0xff] }
  0x33   :  { %593 = vmatpush3.msra.mxu0 %v105_v0  ;;  %v82_v4 = vld [vmem:[#allocation2] sm:$0xff]  ;;  %v100_v6 = vld [vmem:[#allocation5 + $0x50] sm:$0xff]  ;;  %v241_v7 = vld [vmem:[#allocation7 + $0x78] sm:$0xff] }
  0x34   :  { %594 = vmatprep.subr.mxu0 %v104_v1  ;;  %624 = vmatprep.mubr.f32.mxu0 %v82_v4  ;;  %v240_v8 = vld [vmem:[#allocation7 + $0x70] sm:$0xff]  ;;  %v99_v9 = vld [vmem:[#allocation5 + $0x48] sm:$0xff]  ;;  %v98_v11 = vld [vmem:[#allocation5 + $0x40] sm:$0xff] }
  0x35   :  { %595 = vmatpush3.msra.mxu0 %v104_v1  ;;  %636 = vmatprep.subr.mxu1 %v241_v7  ;;  %v239_v10 = vld [vmem:[#allocation7 + $0x68] sm:$0xff]  ;;  %v238_v12 = vld [vmem:[#allocation7 + $0x60] sm:$0xff]  ;;  %v97_v13 = vld [vmem:[#allocation5 + $0x38] sm:$0xff] }
  0x36   :  { %596 = vmatprep.subr.mxu0 %v103_v2  ;;  %637 = vmatpush3.msra.mxu1 %v241_v7  ;;  %v237_v14 = vld [vmem:[#allocation7 + $0x58] sm:$0xff]  ;;  %v96_v15 = vld [vmem:[#allocation5 + $0x30] sm:$0xff]  ;;  %v95_v17 = vld [vmem:[#allocation5 + $0x28] sm:$0xff] }
  0x37   :  { %597 = vmatpush3.msra.mxu0 %v103_v2  ;;  %638 = vmatprep.subr.mxu1 %v240_v8  ;;  %v236_v16 = vld [vmem:[#allocation7 + $0x50] sm:$0xff]  ;;  %v235_v18 = vld [vmem:[#allocation7 + $0x48] sm:$0xff]  ;;  %v94_v19 = vld [vmem:[#allocation5 + $0x20] sm:$0xff] }
  0x38   :  { %598 = vmatprep.subr.mxu0 %v102_v3  ;;  %639 = vmatpush3.msra.mxu1 %v240_v8  ;;  %v234_v20 = vld [vmem:[#allocation7 + $0x40] sm:$0xff]  ;;  %v93_v21 = vld [vmem:[#allocation5 + $0x18] sm:$0xff]  ;;  %v92_v23 = vld [vmem:[#allocation5 + $0x10] sm:$0xff] }
  0x39   :  { %599 = vmatpush3.msra.mxu0 %v102_v3  ;;  %640 = vmatprep.subr.mxu1 %v239_v10  ;;  %v233_v22 = vld [vmem:[#allocation7 + $0x38] sm:$0xff]  ;;  %v232_v24 = vld [vmem:[#allocation7 + $0x30] sm:$0xff]  ;;  %v91_v25 = vld [vmem:[#allocation5 + $0x8] sm:$0xff] }
  0x3a   :  { %600 = vmatprep.subr.mxu0 %v101_v5  ;;  %641 = vmatpush3.msra.mxu1 %v239_v10  ;;  %v231_v26 = vld [vmem:[#allocation7 + $0x28] sm:$0xff]  ;;  %v90_v27 = vld [vmem:[#allocation5] sm:$0xff]  ;;  %v84_v30 = vld [vmem:[#allocation2 + $0x10] sm:$0xff] }
  0x3b   :  { %601 = vmatpush3.msra.mxu0 %v101_v5  ;;  %642 = vmatprep.subr.mxu1 %v238_v12  ;;  %v230_v28 = vld [vmem:[#allocation7 + $0x20] sm:$0xff]  ;;  %v83_v29 = vld [vmem:[#allocation2 + $0x8] sm:$0xff]  ;;  %v85_v31 = vld [vmem:[#allocation2 + $0x18] sm:$0xff] }
  0x3c   :  { %602 = vmatprep.subr.mxu0 %v100_v6  ;;  %643 = vmatpush3.msra.mxu1 %v238_v12  ;;  %v86_v32 = vld [vmem:[#allocation2 + $0x20] sm:$0xff]  ;;  %v87_v33 = vld [vmem:[#allocation2 + $0x28] sm:$0xff]  ;;  %v88_v34 = vld [vmem:[#allocation2 + $0x30] sm:$0xff] }
  0x3d   :  { %603 = vmatpush3.msra.mxu0 %v100_v6  ;;  %644 = vmatprep.subr.mxu1 %v237_v14  ;;  %v89_v35 = vld [vmem:[#allocation2 + $0x38] sm:$0xff]  ;;  %v228_v37 = vld [vmem:[#allocation7 + $0x10] sm:$0xff]  ;;  %v227_v38 = vld [vmem:[#allocation7 + $0x8] sm:$0xff] }
  0x3e   :  { %604 = vmatprep.subr.mxu0 %v99_v9  ;;  %645 = vmatpush3.msra.mxu1 %v237_v14  ;;  %v229_v36 = vld [vmem:[#allocation7 + $0x18] sm:$0xff]  ;;  %v226_v39 = vld [vmem:[#allocation7] sm:$0xff]  ;;  %v376_v41 = vld [vmem:[#allocation8 + $0x70] sm:$0xff] }
  0x3f   :  { %605 = vmatpush3.msra.mxu0 %v99_v9  ;;  %646 = vmatprep.subr.mxu1 %v236_v16  ;;  %v377_v40 = vld [vmem:[#allocation8 + $0x78] sm:$0xff]  ;;  %v375_v42 = vld [vmem:[#allocation8 + $0x68] sm:$0xff]  ;;  %v374_v43 = vld [vmem:[#allocation8 + $0x60] sm:$0xff] }
  0x40   :  { %606 = vmatprep.subr.mxu0 %v98_v11  ;;  %647 = vmatpush3.msra.mxu1 %v236_v16  ;;  %v942_v44 = vld [vmem:[#allocation8 + $0x58] sm:$0xff]  ;;  %v944_v45 = vld [vmem:[#allocation8 + $0x50] sm:$0xff]  ;;  %v948_v46 = vld [vmem:[#allocation8 + $0x48] sm:$0xff] }
  0x41   :  { %607 = vmatpush3.msra.mxu0 %v98_v11  ;;  %648 = vmatprep.subr.mxu1 %v235_v18  ;;  %v952_v47 = vld [vmem:[#allocation8 + $0x40] sm:$0xff]  ;;  %v369_v48 = vld [vmem:[#allocation8 + $0x38] sm:$0xff]  ;;  %v368_v49 = vld [vmem:[#allocation8 + $0x30] sm:$0xff] }
  0x42   :  { %608 = vmatprep.subr.mxu0 %v97_v13  ;;  %649 = vmatpush3.msra.mxu1 %v235_v18  ;;  %v367_v50 = vld [vmem:[#allocation8 + $0x28] sm:$0xff]  ;;  %v366_v51 = vld [vmem:[#allocation8 + $0x20] sm:$0xff]  ;;  %v364_v14 = vld [vmem:[#allocation8 + $0x10] sm:$0xff] }
  0x43   :  { %609 = vmatpush3.msra.mxu0 %v97_v13  ;;  %650 = vmatprep.subr.mxu1 %v234_v20  ;;  %v517_v52 = vld [vmem:[%s983_s2] ss:$0 sm:$0xff]  ;;  %v365_v13 = vld [vmem:[#allocation8 + $0x18] sm:$0xff] }
  0x44   :  { %610 = vmatprep.subr.mxu0 %v96_v15  ;;  %651 = vmatpush3.msra.mxu1 %v234_v20  ;;  %v362_v16 = vld [vmem:[#allocation8] sm:$0xff] }
  0x45   :  { %611 = vmatpush3.msra.mxu0 %v96_v15  ;;  %652 = vmatprep.subr.mxu1 %v233_v22  ;;  %v363_v15 = vld [vmem:[#allocation8 + $0x8] sm:$0xff] }
  0x46   :  { %612 = vmatprep.subr.mxu0 %v95_v17  ;;  %653 = vmatpush3.msra.mxu1 %v233_v22 }
  0x47   :  { %613 = vmatpush3.msra.mxu0 %v95_v17  ;;  %654 = vmatprep.subr.mxu1 %v232_v24  ;;  %v518_v17 = vld [vmem:[%s985_s4] ss:$0 sm:$0xff] }
  0x48   :  { %614 = vmatprep.subr.mxu0 %v94_v19  ;;  %655 = vmatpush3.msra.mxu1 %v232_v24 }
  0x49   :  { %615 = vmatpush3.msra.mxu0 %v94_v19  ;;  %656 = vmatprep.subr.mxu1 %v231_v26 }
  0x4a   :  { %616 = vmatprep.subr.mxu0 %v93_v21  ;;  %657 = vmatpush3.msra.mxu1 %v231_v26 }
  0x4b   :  { %617 = vmatpush3.msra.mxu0 %v93_v21  ;;  %658 = vmatprep.subr.mxu1 %v230_v28 }
  0x4c   :  { %618 = vmatprep.subr.mxu0 %v92_v23  ;;  %659 = vmatpush3.msra.mxu1 %v230_v28 }
  0x4d   :  { %619 = vmatpush3.msra.mxu0 %v92_v23  ;;  %660 = vmatprep.subr.mxu1 %v229_v36 }
  0x4e   :  { %620 = vmatprep.subr.mxu0 %v91_v25  ;;  %661 = vmatpush3.msra.mxu1 %v229_v36 }
  0x4f   :  { %621 = vmatpush3.msra.mxu0 %v91_v25  ;;  %662 = vmatprep.subr.mxu1 %v228_v37 }
  0x50   :  { %622 = vmatprep.subr.mxu0 %v90_v27  ;;  %663 = vmatpush3.msra.mxu1 %v228_v37 }
  0x51   :  { %623 = vmatpush3.msra.mxu0 %v90_v27  ;;  %664 = vmatprep.subr.mxu1 %v227_v38 }
  0x52   :  { %625 = vmatmul.mubr.f32.vlgmr.msra.gmra.mxu0 %v83_v29  ;;  %665 = vmatpush3.msra.mxu1 %v227_v38 }
  0x53   :  { %627 = vmatprep.mubr.f32.mxu0 %v84_v30  ;;  %666 = vmatprep.subr.mxu1 %v226_v39 }
  0x54   :  { %667 = vmatpush3.msra.mxu1 %v226_v39  ;;  %680 = vmatprep.subr.mxu0 %v377_v40 }
  0x55   :  { %724 = vmatprep.subr.mxu1 %v377_v40  ;;  %681 = vmatpush3.msra.mxu0 %v377_v40 }
  0x56   :  { %628 = vmatmul.mubr.f32.gmra.mxu0 %v85_v31  ;;  %682 = vmatprep.subr.mxu0 %v376_v41 }
  0x57   :  { %630 = vmatprep.mubr.f32.mxu0 %v86_v32  ;;  %683 = vmatpush3.msra.mxu0 %v376_v41 }
  0x58   :  { %684 = vmatprep.subr.mxu0 %v375_v42 }
  0x59   :  { %685 = vmatpush3.msra.mxu0 %v375_v42 }
  0x5a   :  { %631 = vmatmul.mubr.f32.gmra.mxu0 %v87_v33  ;;  %686 = vmatprep.subr.mxu0 %v374_v43 }
  0x5b   :  { %633 = vmatprep.mubr.f32.mxu0 %v88_v34  ;;  %687 = vmatpush3.msra.mxu0 %v374_v43 }
  0x5c   :  { %688 = vmatprep.subr.mxu0 %v942_v44 }
  0x5d   :  { %689 = vmatpush3.msra.mxu0 %v942_v44 }
  0x5e   :  { %634 = vmatmul.mubr.f32.gmra.mxu0 %v89_v35  ;;  %690 = vmatprep.subr.mxu0 %v944_v45 }
  0x5f   :  { %691 = vmatpush3.msra.mxu0 %v944_v45 }
  0x60   :  { %692 = vmatprep.subr.mxu0 %v948_v46 }
  0x61   :  { %693 = vmatpush3.msra.mxu0 %v948_v46 }
  0x62   :  { %694 = vmatprep.subr.mxu0 %v952_v47 }
  0x63   :  { %695 = vmatpush3.msra.mxu0 %v952_v47 }
  0x64   :  { %696 = vmatprep.subr.mxu0 %v369_v48 }
  0x65   :  { %697 = vmatpush3.msra.mxu0 %v369_v48 }
  0x66   :  { %698 = vmatprep.subr.mxu0 %v368_v49 }
  0x67   :  { %699 = vmatpush3.msra.mxu0 %v368_v49 }
  0x68   :  { %700 = vmatprep.subr.mxu0 %v367_v50 }
  0x69   :  { %701 = vmatpush3.msra.mxu0 %v367_v50 }
  0x6a   :  { %702 = vmatprep.subr.mxu0 %v366_v51 }
  0x6b   :  { %703 = vmatpush3.msra.mxu0 %v366_v51 }
  0x6c   :  { %704 = vmatprep.subr.mxu0 %v365_v13 }
  0x6d   :  { %705 = vmatpush3.msra.mxu0 %v365_v13 }
  0x6e   :  { %706 = vmatprep.subr.mxu0 %v364_v14 }
  0x6f   :  { %707 = vmatpush3.msra.mxu0 %v364_v14 }
  0x70   :  { %708 = vmatprep.subr.mxu0 %v363_v15 }
  0x71   :  { %709 = vmatpush3.msra.mxu0 %v363_v15 }
  0x72   :  { %710 = vmatprep.subr.mxu0 %v362_v16 }
  0x73   :  { %711 = vmatpush3.msra.mxu0 %v362_v16 }
 0x112   :  { %v626_v53 = vpop.f32.mrf.mxu0 }
 0x113   :  { %v185_v54 = vadd.f32 %v626_v53, %v517_v52 }
 0x114   :  { %v179_v55 = vpop.f32.mrf.mxu0 }
 0x115   :  { %v180_v56 = vadd.f32 %v517_v52, %v179_v55  ;;  %v219_v59 = vmax.f32 %v185_v54, 0.0 }
 0x116   :  { %v629_v57 = vpop.f32.mrf.mxu0 }
 0x117   :  { %v218_v58 = vmax.f32 %v180_v56, 0.0  ;;  %v195_v60 = vadd.f32 %v629_v57, %v517_v52 }
 0x118   :  { %v189_v61 = vpop.f32.mrf.mxu0 }
 0x119   :  { %v190_v62 = vadd.f32 %v517_v52, %v189_v61  ;;  %668 = vmatprep.mubr.f32.mxu1 %v218_v58  ;;  %v221_v1 = vmax.f32 %v195_v60, 0.0 }
 0x11a   :  { %v632_v63 = vpop.f32.mrf.mxu0  ;;  %669 = vmatmul.mubr.f32.vlgmr.msra.gmra.mxu1 %v219_v59 }
 0x11b   :  { %v220_v0 = vmax.f32 %v190_v62, 0.0  ;;  %740 = vmatpush3.msra.mxu1 %v377_v40  ;;  %v205_v2 = vadd.f32 %v632_v63, %v517_v52 }
 0x11c   :  { %v199_v3 = vpop.f32.mrf.mxu0  ;;  %725 = vmatprep.subr.mxu1 %v376_v41 }
 0x11d   :  { %v200_v4 = vadd.f32 %v517_v52, %v199_v3  ;;  %671 = vmatprep.mubr.f32.mxu1 %v220_v0  ;;  %741 = vmatpush3.msra.mxu1 %v376_v41  ;;  %v223_v7 = vmax.f32 %v205_v2, 0.0 }
 0x11e   :  { %v635_v5 = vpop.f32.mrf.mxu0  ;;  %672 = vmatmul.mubr.f32.gmra.mxu1 %v221_v1  ;;  %726 = vmatprep.subr.mxu1 %v375_v42 }
 0x11f   :  { %v222_v6 = vmax.f32 %v200_v4, 0.0  ;;  %742 = vmatpush3.msra.mxu1 %v375_v42  ;;  %v215_v8 = vadd.f32 %v635_v5, %v517_v52  ;;  %v519_v42 = vld [vmem:[%s987_s6] ss:$0 sm:$0xff]  ;;  %s503_s6 = sshll.u32 %s877_s23, 4  ;;  %s504_s6 = int_to_ptr.vmem [resolvable:$true] %s503_s6 }
 0x120   :  { %v209_v9 = vpop.f32.mrf.mxu0  ;;  %727 = vmatprep.subr.mxu1 %v374_v43  ;;  %s843_s24 = scalar_lea.vmem %s504_s6, 1024  ;;  %p848_p7 = scmp.lt.s32.totalorder %s504_s6, %s504_s6 }
 0x121   :  { %v210_v10 = vadd.f32 %v517_v52, %v209_v9  ;;  %674 = vmatprep.mubr.f32.mxu1 %v222_v6  ;;  %743 = vmatpush3.msra.mxu1 %v374_v43  ;;  %v225_v12 = vmax.f32 %v215_v8, 0.0  ;;  %p844_p6 = scmp.ne.s32.totalorder %s504_s6, %s843_s24  ;;  %p849_p8 = scmp.lt.s32.totalorder %s843_s24, %s843_s24 }
 0x122   :  { %675 = vmatmul.mubr.f32.gmra.mxu1 %v223_v7  ;;  %728 = vmatprep.subr.mxu1 %v942_v44 }
 0x123   :  { %v224_v11 = vmax.f32 %v210_v10, 0.0  ;;  %744 = vmatpush3.msra.mxu1 %v942_v44  ;;  %p850_p9 = por %p849_p8, %p848_p7 }
 0x124   :  { %729 = vmatprep.subr.mxu1 %v944_v45 }
 0x125   :  { %677 = vmatprep.mubr.f32.mxu1 %v224_v11  ;;  %745 = vmatpush3.msra.mxu1 %v944_v45  ;;  %p851_p10 = pnand %p850_p9, %p844_p6 }
 0x126   :  { %678 = vmatmul.mubr.f32.gmra.mxu1 %v225_v12  ;;  %730 = vmatprep.subr.mxu1 %v948_v46 }
 0x127   :  { %746 = vmatpush3.msra.mxu1 %v948_v46 }
 0x128   :  { %731 = vmatprep.subr.mxu1 %v952_v47 }
 0x129   :  { %747 = vmatpush3.msra.mxu1 %v952_v47 }
 0x12a   :  { %732 = vmatprep.subr.mxu1 %v369_v48 }
 0x12b   :  { %748 = vmatpush3.msra.mxu1 %v369_v48 }
 0x12c   :  { %733 = vmatprep.subr.mxu1 %v368_v49 }
 0x12d   :  { %749 = vmatpush3.msra.mxu1 %v368_v49 }
 0x12e   :  { %734 = vmatprep.subr.mxu1 %v367_v50 }
 0x12f   :  { %750 = vmatpush3.msra.mxu1 %v367_v50 }
 0x130   :  { %735 = vmatprep.subr.mxu1 %v366_v51 }
 0x131   :  { %751 = vmatpush3.msra.mxu1 %v366_v51 }
 0x132   :  { %736 = vmatprep.subr.mxu1 %v365_v13 }
 0x133   :  { %752 = vmatpush3.msra.mxu1 %v365_v13 }
 0x134   :  { %737 = vmatprep.subr.mxu1 %v364_v14 }
 0x135   :  { %753 = vmatpush3.msra.mxu1 %v364_v14 }
 0x136   :  { %738 = vmatprep.subr.mxu1 %v363_v15 }
 0x137   :  { %754 = vmatpush3.msra.mxu1 %v363_v15 }
 0x138   :  { %739 = vmatprep.subr.mxu1 %v362_v16 }
 0x139   :  { %755 = vmatpush3.msra.mxu1 %v362_v16 }
 0x1da   :  { %v670_v18 = vpop.f32.mrf.mxu1 }
 0x1db   :  { %v321_v19 = vadd.f32 %v670_v18, %v518_v17 }
 0x1dc   :  { %v315_v20 = vpop.f32.mrf.mxu1 }
 0x1dd   :  { %v316_v21 = vadd.f32 %v518_v17, %v315_v20  ;;  %v355_v24 = vmax.f32 %v321_v19, 0.0 }
 0x1de   :  { %v673_v22 = vpop.f32.mrf.mxu1 }
 0x1df   :  { %v354_v23 = vmax.f32 %v316_v21, 0.0  ;;  %v331_v25 = vadd.f32 %v673_v22, %v518_v17 }
 0x1e0   :  { %v325_v26 = vpop.f32.mrf.mxu1 }
 0x1e1   :  { %v326_v27 = vadd.f32 %v518_v17, %v325_v26  ;;  %712 = vmatprep.mubr.f32.mxu0 %v354_v23  ;;  %v357_v30 = vmax.f32 %v331_v25, 0.0 }
 0x1e2   :  { %v676_v28 = vpop.f32.mrf.mxu1  ;;  %713 = vmatmul.mubr.f32.vlgmr.msra.gmra.mxu0 %v355_v24 }
 0x1e3   :  { %v356_v29 = vmax.f32 %v326_v27, 0.0  ;;  %v341_v31 = vadd.f32 %v676_v28, %v518_v17 }
 0x1e4   :  { %v335_v32 = vpop.f32.mrf.mxu1 }
 0x1e5   :  { %v336_v33 = vadd.f32 %v518_v17, %v335_v32  ;;  %715 = vmatprep.mubr.f32.mxu0 %v356_v29  ;;  %v359_v36 = vmax.f32 %v341_v31, 0.0 }
 0x1e6   :  { %v679_v34 = vpop.f32.mrf.mxu1  ;;  %716 = vmatmul.mubr.f32.gmra.mxu0 %v357_v30 }
 0x1e7   :  { %v358_v35 = vmax.f32 %v336_v33, 0.0  ;;  %v351_v37 = vadd.f32 %v679_v34, %v518_v17 }
 0x1e8   :  { %v345_v38 = vpop.f32.mrf.mxu1 }
 0x1e9   :  { %v346_v39 = vadd.f32 %v518_v17, %v345_v38  ;;  %718 = vmatprep.mubr.f32.mxu1 %v358_v35  ;;  %v361_v41 = vmax.f32 %v351_v37, 0.0 }
 0x1ea   :  { %719 = vmatmul.mubr.f32.vlgmr.msra.gmra.mxu1 %v359_v36 }
 0x1eb   :  { %v360_v40 = vmax.f32 %v346_v39, 0.0 }
 0x1ed   :  { %721 = vmatprep.mubr.f32.mxu1 %v360_v40 }
 0x1ee   :  { %722 = vmatmul.mubr.f32.gmra.mxu1 %v361_v41 }
 0x2a2   :  { %v714_v43 = vpop.f32.mrf.mxu0 }
 0x2a3   :  { %v457_v44 = vadd.f32 %v714_v43, %v519_v42 }
 0x2a4   :  { %v451_v45 = vpop.f32.mrf.mxu0 }
 0x2a5   :  { %491 = vst [vmem:[#allocation10 + $0x8] sm:$0xff] %v457_v44  ;;  %v452_v46 = vadd.f32 %v519_v42, %v451_v45 }
 0x2a6   :  { %v717_v47 = vpop.f32.mrf.mxu0 }
 0x2a7   :  { %490 = vst [vmem:[#allocation10] sm:$0xff] %v452_v46  ;;  %v467_v48 = vadd.f32 %v717_v47, %v519_v42 }
 0x2a8   :  { %v461_v49 = vpop.f32.mrf.mxu0 }
 0x2a9   :  { %493 = vst [vmem:[#allocation10 + $0x18] sm:$0xff] %v467_v48  ;;  %v462_v50 = vadd.f32 %v519_v42, %v461_v49 }
 0x2aa   :  { %v720_v51 = vpop.f32.mrf.mxu1 }
 0x2ab   :  { %492 = vst [vmem:[#allocation10 + $0x10] sm:$0xff] %v462_v50  ;;  %v477_v52 = vadd.f32 %v720_v51, %v519_v42 }
 0x2ac   :  { %v471_v53 = vpop.f32.mrf.mxu1 }
 0x2ad   :  { %495 = vst [vmem:[#allocation10 + $0x28] sm:$0xff] %v477_v52  ;;  %v472_v54 = vadd.f32 %v519_v42, %v471_v53 }
 0x2ae   :  { %v723_v55 = vpop.f32.mrf.mxu1 }
 0x2af   :  { %494 = vst [vmem:[#allocation10 + $0x20] sm:$0xff] %v472_v54  ;;  %v487_v56 = vadd.f32 %v723_v55, %v519_v42 }
 0x2b0   :  { %v481_v57 = vpop.f32.mrf.mxu1 }
 0x2b1   :  { %497 = vst [vmem:[#allocation10 + $0x38] sm:$0xff] %v487_v56  ;;  %v482_v58 = vadd.f32 %v519_v42, %v481_v57 }
 0x2b3   :  { %496 = vst [vmem:[#allocation10 + $0x30] sm:$0xff] %v482_v58 }
 0x2b4   :  { %854 = shalt.err (!%p851_p10)
}
 0x2b5   :  { %509 = dma.vmem_to_hbm [thread:$0]  %s504_s6, 1024, %s988_s7, [#allocation4], %s873_s29, %s873_s29, %s874_s30  }
 0x2b6   :  { %869 = dma.done.wait [#allocation4], 1024  }
 0x2b7   :  { %870 = vsyncadd [#allocation4], 4294966272 }
 0x2b8   :  { %513 = vsyncpa [#allocation3], 1 }
 0x2b9   :  { %514 = vsyncpa [#allocation6], 1 }
 0x2ba   :  { %515 = vsyncpa [#allocation9], 1 }
 0x2bb   :  { %516 = vsyncpa [#allocation4], 1 }

// kernel: tpu_custom_call.1
= control target key start
LH: loop header
LB: loop body
LE: loop exit
PB: predicated region body
PF: predicated region fallthrough
CT: control target
= control target key end

     0   :  { %12 = vsyncpa [#allocation3], 0  ;;  %s981_s0 = inlined_call_operand.hbm [shape: f32[64,128], index: 0, kind: input, shape index: {}]   ;;  %s982_s1 = inlined_call_operand.hbm [shape: f32[128,128], index: 1, kind: input, shape index: {}]   ;;  %s983_s2 = inlined_call_operand.vmem [shape: f32[1,128], index: 2, kind: input, shape index: {}]   ;;  %s984_s3 = inlined_call_operand.hbm [shape: f32[128,128], index: 3, kind: input, shape index: {}]   ;;  %s985_s4 = inlined_call_operand.vmem [shape: f32[1,128], index: 4, kind: input, shape index: {}]   ;;  %s986_s5 = inlined_call_operand.hbm [shape: f32[128,128], index: 5, kind: input, shape index: {}]   ;;  %s987_s6 = inlined_call_operand.vmem [shape: f32[1,128], index: 6, kind: input, shape index: {}]   ;;  %s988_s7 = inlined_call_operand.hbm [shape: f32[64,128], index: 7, kind: output, shape index: {}]  }
   0x1   :  { %13 = vsyncpa [#allocation6], 0 }
   0x2   :  { %14 = vsyncpa [#allocation9], 0 }
   0x3   :  { %15 = vsyncpa [#allocation4], 0  ;;  %s871_s24 = smov [#allocation5]   ;;  %s872_s26 = smov [#allocation2]  }
   0x4   :  { %s33_s25 = sshll.u32 %s871_s24, 4  ;;  %s21_s27 = sshll.u32 %s872_s26, 4  ;;  %s34_s25 = int_to_ptr.vmem [resolvable:$true] %s33_s25  ;;  %s22_s27 = int_to_ptr.vmem [resolvable:$true] %s21_s27 }
   0x5   :  { %s771_s28 = scalar_lea.vmem %s34_s25, 2048  ;;  %p776_p1 = scmp.lt.s32.totalorder %s34_s25, %s34_s25 }
   0x6   :  { %p772_p0 = scmp.ne.s32.totalorder %s34_s25, %s771_s28  ;;  %p777_p2 = scmp.lt.s32.totalorder %s771_s28, %s771_s28 }
   0x8   :  { %p778_p3 = por %p777_p2, %p776_p1 }
   0xa   :  { %p779_p4 = pnand %p778_p3, %p772_p0 }
   0xc   :  { %782 = shalt.err (!%p779_p4)
}
   0xd   :  { %s873_s29 = smov 128   ;;  %s874_s30 = smov 8  }
   0xe   :  { %39 = dma.hbm_to_vmem [thread:$0]  %s982_s1, 2048, %s34_s25, [#allocation6], %s873_s29, %s873_s29, %s874_s30  }
   0xf   :  { %s791_s10 = scalar_lea.vmem %s22_s27, 1024  ;;  %p796_p6 = scmp.lt.s32.totalorder %s22_s27, %s22_s27 }
  0x10   :  { %p792_p5 = scmp.ne.s32.totalorder %s22_s27, %s791_s10  ;;  %p797_p7 = scmp.lt.s32.totalorder %s791_s10, %s791_s10 }
  0x12   :  { %p798_p8 = por %p797_p7, %p796_p6 }
  0x14   :  { %p799_p9 = pnand %p798_p8, %p792_p5 }
  0x16   :  { %802 = shalt.err (!%p799_p9)
}
  0x17   :  { %27 = dma.hbm_to_vmem [thread:$0]  %s981_s0, 1024, %s22_s27, [#allocation3], %s873_s29, %s873_s29, %s874_s30  }
  0x18   :  { %s875_s13 = smov [#allocation7]   ;;  %s876_s15 = smov [#allocation8]  }
  0x19   :  { %s47_s14 = sshll.u32 %s875_s13, 4  ;;  %s61_s16 = sshll.u32 %s876_s15, 4  ;;  %s48_s14 = int_to_ptr.vmem [resolvable:$true] %s47_s14  ;;  %s62_s16 = int_to_ptr.vmem [resolvable:$true] %s61_s16 }
  0x1a   :  { %s811_s1 = scalar_lea.vmem %s48_s14, 2048  ;;  %p816_p11 = scmp.lt.s32.totalorder %s48_s14, %s48_s14 }
  0x1b   :  { %p812_p10 = scmp.ne.s32.totalorder %s48_s14, %s811_s1  ;;  %p817_p12 = scmp.lt.s32.totalorder %s811_s1, %s811_s1 }
  0x1d   :  { %p818_p13 = por %p817_p12, %p816_p11 }
  0x1f   :  { %p819_p0 = pnand %p818_p13, %p812_p10 }
  0x21   :  { %822 = shalt.err (!%p819_p0)
}
  0x22   :  { %53 = dma.hbm_to_vmem [thread:$0]  %s984_s3, 2048, %s48_s14, [#allocation6], %s873_s29, %s873_s29, %s874_s30  }
  0x23   :  { %s831_s0 = scalar_lea.vmem %s62_s16, 2048  ;;  %p836_p2 = scmp.lt.s32.totalorder %s62_s16, %s62_s16 }
  0x24   :  { %p832_p1 = scmp.ne.s32.totalorder %s62_s16, %s831_s0  ;;  %p837_p3 = scmp.lt.s32.totalorder %s831_s0, %s831_s0 }
  0x26   :  { %p838_p4 = por %p837_p3, %p836_p2 }
  0x28   :  { %p839_p5 = pnand %p838_p4, %p832_p1 }
  0x2a   :  { %842 = shalt.err (!%p839_p5)
}
  0x2b   :  { %67 = dma.hbm_to_vmem [thread:$0]  %s986_s5, 2048, %s62_s16, [#allocation9], %s873_s29, %s873_s29, %s874_s30  }
  0x2c   :  { %863 = dma.done.wait [#allocation3], 1024  }
  0x2d   :  { %864 = vsyncadd [#allocation3], 4294966272 }
  0x2e   :  { %865 = dma.done.wait [#allocation6], 4096  }
  0x2f   :  { %866 = vsyncadd [#allocation6], 4294963200 }
  0x30   :  { %867 = dma.done.wait [#allocation9], 2048  }
  0x31   :  { %868 = vsyncadd [#allocation9], 4294965248  ;;  %v105_v0 = vld [vmem:[#allocation5 + $0x78] sm:$0xff]  ;;  %v104_v1 = vld [vmem:[#allocation5 + $0x70] sm:$0xff]  ;;  %s877_s23 = smov [#allocation10]  }
  0x32   :  { %592 = vmatprep.subr.mxu0 %v105_v0  ;;  %v103_v2 = vld [vmem:[#allocation5 + $0x68] sm:$0xff]  ;;  %v102_v3 = vld [vmem:[#allocation5 + $0x60] sm:$0xff]  ;;  %v101_v5 = vld [vmem:[#allocation5 + $0x58] sm:$0xff] }
  0x33   :  { %593 = vmatpush3.msra.mxu0 %v105_v0  ;;  %v82_v4 = vld [vmem:[#allocation2] sm:$0xff]  ;;  %v100_v6 = vld [vmem:[#allocation5 + $0x50] sm:$0xff]  ;;  %v241_v7 = vld [vmem:[#allocation7 + $0x78] sm:$0xff] }
  0x34   :  { %594 = vmatprep.subr.mxu0 %v104_v1  ;;  %624 = vmatprep.mubr.f32.mxu0 %v82_v4  ;;  %v240_v8 = vld [vmem:[#allocation7 + $0x70] sm:$0xff]  ;;  %v99_v9 = vld [vmem:[#allocation5 + $0x48] sm:$0xff]  ;;  %v98_v11 = vld [vmem:[#allocation5 + $0x40] sm:$0xff] }
  0x35   :  { %595 = vmatpush3.msra.mxu0 %v104_v1  ;;  %636 = vmatprep.subr.mxu1 %v241_v7  ;;  %v239_v10 = vld [vmem:[#allocation7 + $0x68] sm:$0xff]  ;;  %v238_v12 = vld [vmem:[#allocation7 + $0x60] sm:$0xff]  ;;  %v97_v13 = vld [vmem:[#allocation5 + $0x38] sm:$0xff] }
  0x36   :  { %596 = vmatprep.subr.mxu0 %v103_v2  ;;  %637 = vmatpush3.msra.mxu1 %v241_v7  ;;  %v237_v14 = vld [vmem:[#allocation7 + $0x58] sm:$0xff]  ;;  %v96_v15 = vld [vmem:[#allocation5 + $0x30] sm:$0xff]  ;;  %v95_v17 = vld [vmem:[#allocation5 + $0x28] sm:$0xff] }
  0x37   :  { %597 = vmatpush3.msra.mxu0 %v103_v2  ;;  %638 = vmatprep.subr.mxu1 %v240_v8  ;;  %v236_v16 = vld [vmem:[#allocation7 + $0x50] sm:$0xff]  ;;  %v235_v18 = vld [vmem:[#allocation7 + $0x48] sm:$0xff]  ;;  %v94_v19 = vld [vmem:[#allocation5 + $0x20] sm:$0xff] }
  0x38   :  { %598 = vmatprep.subr.mxu0 %v102_v3  ;;  %639 = vmatpush3.msra.mxu1 %v240_v8  ;;  %v234_v20 = vld [vmem:[#allocation7 + $0x40] sm:$0xff]  ;;  %v93_v21 = vld [vmem:[#allocation5 + $0x18] sm:$0xff]  ;;  %v92_v23 = vld [vmem:[#allocation5 + $0x10] sm:$0xff] }
  0x39   :  { %599 = vmatpush3.msra.mxu0 %v102_v3  ;;  %640 = vmatprep.subr.mxu1 %v239_v10  ;;  %v233_v22 = vld [vmem:[#allocation7 + $0x38] sm:$0xff]  ;;  %v232_v24 = vld [vmem:[#allocation7 + $0x30] sm:$0xff]  ;;  %v91_v25 = vld [vmem:[#allocation5 + $0x8] sm:$0xff] }
  0x3a   :  { %600 = vmatprep.subr.mxu0 %v101_v5  ;;  %641 = vmatpush3.msra.mxu1 %v239_v10  ;;  %v231_v26 = vld [vmem:[#allocation7 + $0x28] sm:$0xff]  ;;  %v90_v27 = vld [vmem:[#allocation5] sm:$0xff]  ;;  %v84_v30 = vld [vmem:[#allocation2 + $0x10] sm:$0xff] }
  0x3b   :  { %601 = vmatpush3.msra.mxu0 %v101_v5  ;;  %642 = vmatprep.subr.mxu1 %v238_v12  ;;  %v230_v28 = vld [vmem:[#allocation7 + $0x20] sm:$0xff]  ;;  %v83_v29 = vld [vmem:[#allocation2 + $0x8] sm:$0xff]  ;;  %v85_v31 = vld [vmem:[#allocation2 + $0x18] sm:$0xff] }
  0x3c   :  { %602 = vmatprep.subr.mxu0 %v100_v6  ;;  %643 = vmatpush3.msra.mxu1 %v238_v12  ;;  %v86_v32 = vld [vmem:[#allocation2 + $0x20] sm:$0xff]  ;;  %v87_v33 = vld [vmem:[#allocation2 + $0x28] sm:$0xff]  ;;  %v88_v34 = vld [vmem:[#allocation2 + $0x30] sm:$0xff] }
  0x3d   :  { %603 = vmatpush3.msra.mxu0 %v100_v6  ;;  %644 = vmatprep.subr.mxu1 %v237_v14  ;;  %v89_v35 = vld [vmem:[#allocation2 + $0x38] sm:$0xff]  ;;  %v228_v37 = vld [vmem:[#allocation7 + $0x10] sm:$0xff]  ;;  %v227_v38 = vld [vmem:[#allocation7 + $0x8] sm:$0xff] }
  0x3e   :  { %604 = vmatprep.subr.mxu0 %v99_v9  ;;  %645 = vmatpush3.msra.mxu1 %v237_v14  ;;  %v229_v36 = vld [vmem:[#allocation7 + $0x18] sm:$0xff]  ;;  %v226_v39 = vld [vmem:[#allocation7] sm:$0xff]  ;;  %v376_v41 = vld [vmem:[#allocation8 + $0x70] sm:$0xff] }
  0x3f   :  { %605 = vmatpush3.msra.mxu0 %v99_v9  ;;  %646 = vmatprep.subr.mxu1 %v236_v16  ;;  %v377_v40 = vld [vmem:[#allocation8 + $0x78] sm:$0xff]  ;;  %v375_v42 = vld [vmem:[#allocation8 + $0x68] sm:$0xff]  ;;  %v374_v43 = vld [vmem:[#allocation8 + $0x60] sm:$0xff] }
  0x40   :  { %606 = vmatprep.subr.mxu0 %v98_v11  ;;  %647 = vmatpush3.msra.mxu1 %v236_v16  ;;  %v942_v44 = vld [vmem:[#allocation8 + $0x58] sm:$0xff]  ;;  %v944_v45 = vld [vmem:[#allocation8 + $0x50] sm:$0xff]  ;;  %v948_v46 = vld [vmem:[#allocation8 + $0x48] sm:$0xff] }
  0x41   :  { %607 = vmatpush3.msra.mxu0 %v98_v11  ;;  %648 = vmatprep.subr.mxu1 %v235_v18  ;;  %v952_v47 = vld [vmem:[#allocation8 + $0x40] sm:$0xff]  ;;  %v369_v48 = vld [vmem:[#allocation8 + $0x38] sm:$0xff]  ;;  %v368_v49 = vld [vmem:[#allocation8 + $0x30] sm:$0xff] }
  0x42   :  { %608 = vmatprep.subr.mxu0 %v97_v13  ;;  %649 = vmatpush3.msra.mxu1 %v235_v18  ;;  %v367_v50 = vld [vmem:[#allocation8 + $0x28] sm:$0xff]  ;;  %v366_v51 = vld [vmem:[#allocation8 + $0x20] sm:$0xff]  ;;  %v364_v14 = vld [vmem:[#allocation8 + $0x10] sm:$0xff] }
  0x43   :  { %609 = vmatpush3.msra.mxu0 %v97_v13  ;;  %650 = vmatprep.subr.mxu1 %v234_v20  ;;  %v517_v52 = vld [vmem:[%s983_s2] ss:$0 sm:$0xff]  ;;  %v365_v13 = vld [vmem:[#allocation8 + $0x18] sm:$0xff] }
  0x44   :  { %610 = vmatprep.subr.mxu0 %v96_v15  ;;  %651 = vmatpush3.msra.mxu1 %v234_v20  ;;  %v362_v16 = vld [vmem:[#allocation8] sm:$0xff] }
  0x45   :  { %611 = vmatpush3.msra.mxu0 %v96_v15  ;;  %652 = vmatprep.subr.mxu1 %v233_v22  ;;  %v363_v15 = vld [vmem:[#allocation8 + $0x8] sm:$0xff] }
  0x46   :  { %612 = vmatprep.subr.mxu0 %v95_v17  ;;  %653 = vmatpush3.msra.mxu1 %v233_v22 }
  0x47   :  { %613 = vmatpush3.msra.mxu0 %v95_v17  ;;  %654 = vmatprep.subr.mxu1 %v232_v24  ;;  %v518_v17 = vld [vmem:[%s985_s4] ss:$0 sm:$0xff] }
  0x48   :  { %614 = vmatprep.subr.mxu0 %v94_v19  ;;  %655 = vmatpush3.msra.mxu1 %v232_v24 }
  0x49   :  { %615 = vmatpush3.msra.mxu0 %v94_v19  ;;  %656 = vmatprep.subr.mxu1 %v231_v26 }
  0x4a   :  { %616 = vmatprep.subr.mxu0 %v93_v21  ;;  %657 = vmatpush3.msra.mxu1 %v231_v26 }
  0x4b   :  { %617 = vmatpush3.msra.mxu0 %v93_v21  ;;  %658 = vmatprep.subr.mxu1 %v230_v28 }
  0x4c   :  { %618 = vmatprep.subr.mxu0 %v92_v23  ;;  %659 = vmatpush3.msra.mxu1 %v230_v28 }
  0x4d   :  { %619 = vmatpush3.msra.mxu0 %v92_v23  ;;  %660 = vmatprep.subr.mxu1 %v229_v36 }
  0x4e   :  { %620 = vmatprep.subr.mxu0 %v91_v25  ;;  %661 = vmatpush3.msra.mxu1 %v229_v36 }
  0x4f   :  { %621 = vmatpush3.msra.mxu0 %v91_v25  ;;  %662 = vmatprep.subr.mxu1 %v228_v37 }
  0x50   :  { %622 = vmatprep.subr.mxu0 %v90_v27  ;;  %663 = vmatpush3.msra.mxu1 %v228_v37 }
  0x51   :  { %623 = vmatpush3.msra.mxu0 %v90_v27  ;;  %664 = vmatprep.subr.mxu1 %v227_v38 }
  0x52   :  { %625 = vmatmul.mubr.f32.vlgmr.msra.gmra.mxu0 %v83_v29  ;;  %665 = vmatpush3.msra.mxu1 %v227_v38 }
  0x53   :  { %627 = vmatprep.mubr.f32.mxu0 %v84_v30  ;;  %666 = vmatprep.subr.mxu1 %v226_v39 }
  0x54   :  { %667 = vmatpush3.msra.mxu1 %v226_v39  ;;  %680 = vmatprep.subr.mxu0 %v377_v40 }
  0x55   :  { %724 = vmatprep.subr.mxu1 %v377_v40  ;;  %681 = vmatpush3.msra.mxu0 %v377_v40 }
  0x56   :  { %628 = vmatmul.mubr.f32.gmra.mxu0 %v85_v31  ;;  %682 = vmatprep.subr.mxu0 %v376_v41 }
  0x57   :  { %630 = vmatprep.mubr.f32.mxu0 %v86_v32  ;;  %683 = vmatpush3.msra.mxu0 %v376_v41 }
  0x58   :  { %684 = vmatprep.subr.mxu0 %v375_v42 }
  0x59   :  { %685 = vmatpush3.msra.mxu0 %v375_v42 }
  0x5a   :  { %631 = vmatmul.mubr.f32.gmra.mxu0 %v87_v33  ;;  %686 = vmatprep.subr.mxu0 %v374_v43 }
  0x5b   :  { %633 = vmatprep.mubr.f32.mxu0 %v88_v34  ;;  %687 = vmatpush3.msra.mxu0 %v374_v43 }
  0x5c   :  { %688 = vmatprep.subr.mxu0 %v942_v44 }
  0x5d   :  { %689 = vmatpush3.msra.mxu0 %v942_v44 }
  0x5e   :  { %634 = vmatmul.mubr.f32.gmra.mxu0 %v89_v35  ;;  %690 = vmatprep.subr.mxu0 %v944_v45 }
  0x5f   :  { %691 = vmatpush3.msra.mxu0 %v944_v45 }
  0x60   :  { %692 = vmatprep.subr.mxu0 %v948_v46 }
  0x61   :  { %693 = vmatpush3.msra.mxu0 %v948_v46 }
  0x62   :  { %694 = vmatprep.subr.mxu0 %v952_v47 }
  0x63   :  { %695 = vmatpush3.msra.mxu0 %v952_v47 }
  0x64   :  { %696 = vmatprep.subr.mxu0 %v369_v48 }
  0x65   :  { %697 = vmatpush3.msra.mxu0 %v369_v48 }
  0x66   :  { %698 = vmatprep.subr.mxu0 %v368_v49 }
  0x67   :  { %699 = vmatpush3.msra.mxu0 %v368_v49 }
  0x68   :  { %700 = vmatprep.subr.mxu0 %v367_v50 }
  0x69   :  { %701 = vmatpush3.msra.mxu0 %v367_v50 }
  0x6a   :  { %702 = vmatprep.subr.mxu0 %v366_v51 }
  0x6b   :  { %703 = vmatpush3.msra.mxu0 %v366_v51 }
  0x6c   :  { %704 = vmatprep.subr.mxu0 %v365_v13 }
  0x6d   :  { %705 = vmatpush3.msra.mxu0 %v365_v13 }
  0x6e   :  { %706 = vmatprep.subr.mxu0 %v364_v14 }
  0x6f   :  { %707 = vmatpush3.msra.mxu0 %v364_v14 }
  0x70   :  { %708 = vmatprep.subr.mxu0 %v363_v15 }
  0x71   :  { %709 = vmatpush3.msra.mxu0 %v363_v15 }
  0x72   :  { %710 = vmatprep.subr.mxu0 %v362_v16 }
  0x73   :  { %711 = vmatpush3.msra.mxu0 %v362_v16 }
 0x112   :  { %v626_v53 = vpop.f32.mrf.mxu0 }
 0x113   :  { %v185_v54 = vadd.f32 %v626_v53, %v517_v52 }
 0x114   :  { %v179_v55 = vpop.f32.mrf.mxu0 }
 0x115   :  { %v180_v56 = vadd.f32 %v517_v52, %v179_v55  ;;  %v219_v59 = vmax.f32 %v185_v54, 0.0 }
 0x116   :  { %v629_v57 = vpop.f32.mrf.mxu0 }
 0x117   :  { %v218_v58 = vmax.f32 %v180_v56, 0.0  ;;  %v195_v60 = vadd.f32 %v629_v57, %v517_v52 }
 0x118   :  { %v189_v61 = vpop.f32.mrf.mxu0 }
 0x119   :  { %v190_v62 = vadd.f32 %v517_v52, %v189_v61  ;;  %668 = vmatprep.mubr.f32.mxu1 %v218_v58  ;;  %v221_v1 = vmax.f32 %v195_v60, 0.0 }
 0x11a   :  { %v632_v63 = vpop.f32.mrf.mxu0  ;;  %669 = vmatmul.mubr.f32.vlgmr.msra.gmra.mxu1 %v219_v59 }
 0x11b   :  { %v220_v0 = vmax.f32 %v190_v62, 0.0  ;;  %740 = vmatpush3.msra.mxu1 %v377_v40  ;;  %v205_v2 = vadd.f32 %v632_v63, %v517_v52 }
 0x11c   :  { %v199_v3 = vpop.f32.mrf.mxu0  ;;  %725 = vmatprep.subr.mxu1 %v376_v41 }
 0x11d   :  { %v200_v4 = vadd.f32 %v517_v52, %v199_v3  ;;  %671 = vmatprep.mubr.f32.mxu1 %v220_v0  ;;  %741 = vmatpush3.msra.mxu1 %v376_v41  ;;  %v223_v7 = vmax.f32 %v205_v2, 0.0 }
 0x11e   :  { %v635_v5 = vpop.f32.mrf.mxu0  ;;  %672 = vmatmul.mubr.f32.gmra.mxu1 %v221_v1  ;;  %726 = vmatprep.subr.mxu1 %v375_v42 }
 0x11f   :  { %v222_v6 = vmax.f32 %v200_v4, 0.0  ;;  %742 = vmatpush3.msra.mxu1 %v375_v42  ;;  %v215_v8 = vadd.f32 %v635_v5, %v517_v52  ;;  %v519_v42 = vld [vmem:[%s987_s6] ss:$0 sm:$0xff]  ;;  %s503_s6 = sshll.u32 %s877_s23, 4  ;;  %s504_s6 = int_to_ptr.vmem [resolvable:$true] %s503_s6 }
 0x120   :  { %v209_v9 = vpop.f32.mrf.mxu0  ;;  %727 = vmatprep.subr.mxu1 %v374_v43  ;;  %s843_s24 = scalar_lea.vmem %s504_s6, 1024  ;;  %p848_p7 = scmp.lt.s32.totalorder %s504_s6, %s504_s6 }
 0x121   :  { %v210_v10 = vadd.f32 %v517_v52, %v209_v9  ;;  %674 = vmatprep.mubr.f32.mxu1 %v222_v6  ;;  %743 = vmatpush3.msra.mxu1 %v374_v43  ;;  %v225_v12 = vmax.f32 %v215_v8, 0.0  ;;  %p844_p6 = scmp.ne.s32.totalorder %s504_s6, %s843_s24  ;;  %p849_p8 = scmp.lt.s32.totalorder %s843_s24, %s843_s24 }
 0x122   :  { %675 = vmatmul.mubr.f32.gmra.mxu1 %v223_v7  ;;  %728 = vmatprep.subr.mxu1 %v942_v44 }
 0x123   :  { %v224_v11 = vmax.f32 %v210_v10, 0.0  ;;  %744 = vmatpush3.msra.mxu1 %v942_v44  ;;  %p850_p9 = por %p849_p8, %p848_p7 }
 0x124   :  { %729 = vmatprep.subr.mxu1 %v944_v45 }
 0x125   :  { %677 = vmatprep.mubr.f32.mxu1 %v224_v11  ;;  %745 = vmatpush3.msra.mxu1 %v944_v45  ;;  %p851_p10 = pnand %p850_p9, %p844_p6 }
 0x126   :  { %678 = vmatmul.mubr.f32.gmra.mxu1 %v225_v12  ;;  %730 = vmatprep.subr.mxu1 %v948_v46 }
 0x127   :  { %746 = vmatpush3.msra.mxu1 %v948_v46 }
 0x128   :  { %731 = vmatprep.subr.mxu1 %v952_v47 }
 0x129   :  { %747 = vmatpush3.msra.mxu1 %v952_v47 }
 0x12a   :  { %732 = vmatprep.subr.mxu1 %v369_v48 }
 0x12b   :  { %748 = vmatpush3.msra.mxu1 %v369_v48 }
 0x12c   :  { %733 = vmatprep.subr.mxu1 %v368_v49 }
 0x12d   :  { %749 = vmatpush3.msra.mxu1 %v368_v49 }
 0x12e   :  { %734 = vmatprep.subr.mxu1 %v367_v50 }
 0x12f   :  { %750 = vmatpush3.msra.mxu1 %v367_v50 }
 0x130   :  { %735 = vmatprep.subr.mxu1 %v366_v51 }
 0x131   :  { %751 = vmatpush3.msra.mxu1 %v366_v51 }
 0x132   :  { %736 = vmatprep.subr.mxu1 %v365_v13 }
 0x133   :  { %752 = vmatpush3.msra.mxu1 %v365_v13 }
 0x134   :  { %737 = vmatprep.subr.mxu1 %v364_v14 }
 0x135   :  { %753 = vmatpush3.msra.mxu1 %v364_v14 }
 0x136   :  { %738 = vmatprep.subr.mxu1 %v363_v15 }
 0x137   :  { %754 = vmatpush3.msra.mxu1 %v363_v15 }
 0x138   :  { %739 = vmatprep.subr.mxu1 %v362_v16 }
 0x139   :  { %755 = vmatpush3.msra.mxu1 %v362_v16 }
 0x1da   :  { %v670_v18 = vpop.f32.mrf.mxu1 }
 0x1db   :  { %v321_v19 = vadd.f32 %v670_v18, %v518_v17 }
 0x1dc   :  { %v315_v20 = vpop.f32.mrf.mxu1 }
 0x1dd   :  { %v316_v21 = vadd.f32 %v518_v17, %v315_v20  ;;  %v355_v24 = vmax.f32 %v321_v19, 0.0 }
 0x1de   :  { %v673_v22 = vpop.f32.mrf.mxu1 }
 0x1df   :  { %v354_v23 = vmax.f32 %v316_v21, 0.0  ;;  %v331_v25 = vadd.f32 %v673_v22, %v518_v17 }
 0x1e0   :  { %v325_v26 = vpop.f32.mrf.mxu1 }
 0x1e1   :  { %v326_v27 = vadd.f32 %v518_v17, %v325_v26  ;;  %712 = vmatprep.mubr.f32.mxu0 %v354_v23  ;;  %v357_v30 = vmax.f32 %v331_v25, 0.0 }
 0x1e2   :  { %v676_v28 = vpop.f32.mrf.mxu1  ;;  %713 = vmatmul.mubr.f32.vlgmr.msra.gmra.mxu0 %v355_v24 }
 0x1e3   :  { %v356_v29 = vmax.f32 %v326_v27, 0.0  ;;  %v341_v31 = vadd.f32 %v676_v28, %v518_v17 }
 0x1e4   :  { %v335_v32 = vpop.f32.mrf.mxu1 }
 0x1e5   :  { %v336_v33 = vadd.f32 %v518_v17, %v335_v32  ;;  %715 = vmatprep.mubr.f32.mxu0 %v356_v29  ;;  %v359_v36 = vmax.f32 %v341_v31, 0.0 }
 0x1e6   :  { %v679_v34 = vpop.f32.mrf.mxu1  ;;  %716 = vmatmul.mubr.f32.gmra.mxu0 %v357_v30 }
 0x1e7   :  { %v358_v35 = vmax.f32 %v336_v33, 0.0  ;;  %v351_v37 = vadd.f32 %v679_v34, %v518_v17 }
 0x1e8   :  { %v345_v38 = vpop.f32.mrf.mxu1 }
 0x1e9   :  { %v346_v39 = vadd.f32 %v518_v17, %v345_v38  ;;  %718 = vmatprep.mubr.f32.mxu1 %v358_v35  ;;  %v361_v41 = vmax.f32 %v351_v37, 0.0 }
 0x1ea   :  { %719 = vmatmul.mubr.f32.vlgmr.msra.gmra.mxu1 %v359_v36 }
 0x1eb   :  { %v360_v40 = vmax.f32 %v346_v39, 0.0 }
 0x1ed   :  { %721 = vmatprep.mubr.f32.mxu1 %v360_v40 }
 0x1ee   :  { %722 = vmatmul.mubr.f32.gmra.mxu1 %v361_v41 }
 0x2a2   :  { %v714_v43 = vpop.f32.mrf.mxu0 }
 0x2a3   :  { %v457_v44 = vadd.f32 %v714_v43, %v519_v42 }
 0x2a4   :  { %v451_v45 = vpop.f32.mrf.mxu0 }
 0x2a5   :  { %491 = vst [vmem:[#allocation10 + $0x8] sm:$0xff] %v457_v44  ;;  %v452_v46 = vadd.f32 %v519_v42, %v451_v45 }
 0x2a6   :  { %v717_v47 = vpop.f32.mrf.mxu0 }
 0x2a7   :  { %490 = vst [vmem:[#allocation10] sm:$0xff] %v452_v46  ;;  %v467_v48 = vadd.f32 %v717_v47, %v519_v42 }
 0x2a8   :  { %v461_v49 = vpop.f32.mrf.mxu0 }
 0x2a9   :  { %493 = vst [vmem:[#allocation10 + $0x18] sm:$0xff] %v467_v48  ;;  %v462_v50 = vadd.f32 %v519_v42, %v461_v49 }
 0x2aa   :  { %v720_v51 = vpop.f32.mrf.mxu1 }
 0x2ab   :  { %492 = vst [vmem:[#allocation10 + $0x10] sm:$0xff] %v462_v50  ;;  %v477_v52 = vadd.f32 %v720_v51, %v519_v42 }
 0x2ac   :  { %v471_v53 = vpop.f32.mrf.mxu1 }
 0x2ad   :  { %495 = vst [vmem:[#allocation10 + $0x28] sm:$0xff] %v477_v52  ;;  %v472_v54 = vadd.f32 %v519_v42, %v471_v53 }
 0x2ae   :  { %v723_v55 = vpop.f32.mrf.mxu1 }
 0x2af   :  { %494 = vst [vmem:[#allocation10 + $0x20] sm:$0xff] %v472_v54  ;;  %v487_v56 = vadd.f32 %v723_v55, %v519_v42 }
 0x2b0   :  { %v481_v57 = vpop.f32.mrf.mxu1 }
 0x2b1   :  { %497 = vst [vmem:[#allocation10 + $0x38] sm:$0xff] %v487_v56  ;;  %v482_v58 = vadd.f32 %v519_v42, %v481_v57 }
 0x2b3   :  { %496 = vst [vmem:[#allocation10 + $0x30] sm:$0xff] %v482_v58 }
 0x2b4   :  { %854 = shalt.err (!%p851_p10)
}
 0x2b5   :  { %509 = dma.vmem_to_hbm [thread:$0]  %s504_s6, 1024, %s988_s7, [#allocation4], %s873_s29, %s873_s29, %s874_s30  }
 0x2b6   :  { %869 = dma.done.wait [#allocation4], 1024  }
 0x2b7   :  { %870 = vsyncadd [#allocation4], 4294966272 }
 0x2b8   :  { %513 = vsyncpa [#allocation3], 1 }
 0x2b9   :  { %514 = vsyncpa [#allocation6], 1 }
 0x2ba   :  { %515 = vsyncpa [#allocation9], 1 }
 0x2bb   :  { %516 = vsyncpa [#allocation4], 1 }

</bundles_post_ra>
